<compile_context>
chip_gen: v5e
topology: v5e:2x2
jax: 0.10.0
libtpu: 0.0.40
codegen_flags: <defaults>
</compile_context>

<pallas_src>
import functools

import jax
import jax.numpy as jnp
from jax import lax
from jax.experimental import pallas as pl
from jax.experimental.pallas import tpu as pltpu


def fcn_kernel(x_ref, w_in_ref, b_in_ref, w_h_ref, b_h_ref, w_out_ref,
               b_out_ref, o_ref, *, n_hidden_layers, n_in, n_out, dot_dtype):
    """One batch tile.  x_ref: (n_in, tile), o_ref: (n_out, tile)."""

    def mxu_dot(a, b):
        # Cast only the MXU inputs; accumulate in f32.
        return jnp.dot(a.astype(dot_dtype), b.astype(dot_dtype),
                       preferred_element_type=jnp.float32)

    x_t = x_ref[...]                                   # (n_in, tile), lane-dense

    # ---- Input layer: Linear(N_INPUT, N_HIDDEN) + Tanh -----------------------
    if n_in == 1:
        # K=1 matmul is a degenerate outer product -> do it on the VPU:
        # (H,1) broadcast over lanes  *  (1,tile) broadcast over sublanes.
        pre = w_in_ref[...] * x_t + b_in_ref[...]      # (H, tile)
    else:
        pre = mxu_dot(w_in_ref[...], x_t) + b_in_ref[...]
    h = jnp.tanh(pre)                                  # (H, tile), f32 (EUP)

    # ---- Hidden layers: (N_LAYERS-1) x [Linear(H, H) + Tanh] -----------------
    for l in range(n_hidden_layers):                   # small static unroll
        h = jnp.tanh(mxu_dot(w_h_ref[l], h) + b_h_ref[l])

    # ---- Output layer: Linear(N_HIDDEN, N_OUTPUT), no activation -------------
    if n_out == 1:
        # N=1 matmul -> VPU multiply + sublane (XLU) reduction; result stays
        # lane-dense so the store is an unmasked, full-lane vst.
        y = jnp.sum(w_out_ref[...] * h, axis=0, keepdims=True) + b_out_ref[...]
    else:
        # General case: contract over the hidden (sublane) dim.
        y = lax.dot_general(
            w_out_ref[...].astype(dot_dtype), h.astype(dot_dtype),
            dimension_numbers=(((0,), (0,)), ((), ())),
            preferred_element_type=jnp.float32) + b_out_ref[...]

    o_ref[...] = y                                     # (n_out, tile)


def fcn_forward(x, params, *, tile_b=512, dot_dtype=jnp.float32):
    """x: (B, N_INPUT) float32 -> (B, N_OUTPUT) float32.

    Parameter layouts (see init_fcn_params):
      w_in  : (H, N_INPUT)   b_in  : (H, 1)
      w_h   : (L-1, H, H)    b_h   : (L-1, H, 1)
      w_out : (H, N_OUTPUT)  b_out : (N_OUTPUT, 1)
    """
    w_in, b_in, w_h, b_h, w_out, b_out = params
    B, n_in = x.shape
    n_hidden = w_in.shape[0]
    n_out = w_out.shape[1]
    n_hl = w_h.shape[0]
    assert n_hl >= 1, "expects N_LAYERS >= 2 (as in the pendulum script)"

    # Batch maps to lanes: round the tile down to a multiple of 128 lanes and
    # pad the (possibly ragged) batch up to a whole number of tiles.  Small
    # batches collapse to a single grid step; large batches get multiple
    # "parallel" steps (keeps both v7x TensorCores busy).
    tile = max(128, (min(tile_b, pl.cdiv(B, 128) * 128) // 128) * 128)
    b_pad = pl.cdiv(B, tile) * tile
    grid = (b_pad // tile,)

    # Wrapper-side layout plumbing: present x as a lane-dense (n_in, B_pad) slab.
    x_t = jnp.pad(x, ((0, b_pad - B), (0, 0))).T

    kernel = functools.partial(fcn_kernel, n_hidden_layers=n_hl, n_in=n_in,
                               n_out=n_out, dot_dtype=dot_dtype)

    # Advisory cost hint for XLA's scheduler (tiny, but keeps fusion sane).
    flops = 2 * b_pad * (n_hidden * n_in + n_hl * n_hidden * n_hidden
                         + n_hidden * n_out)
    transcendentals = b_pad * n_hidden * (n_hl + 1)            # tanh count
    bytes_accessed = 4 * (x_t.size + w_in.size + b_in.size + w_h.size
                          + b_h.size + w_out.size + b_out.size
                          + n_out * b_pad)

    out_t = pl.pallas_call(
        kernel,
        out_shape=jax.ShapeDtypeStruct((n_out, b_pad), jnp.float32),
        grid_spec=pltpu.PrefetchScalarGridSpec(
            num_scalar_prefetch=0,
            grid=grid,
            in_specs=[
                # x: tiled over batch (lane dim)
                pl.BlockSpec((n_in, tile), lambda i: (0, i)),
                # weights / biases: full arrays, same block every grid step
                # (constant index_map => resident, no re-DMA)
                pl.BlockSpec((n_hidden, n_in), lambda i: (0, 0)),
                pl.BlockSpec((n_hidden, 1), lambda i: (0, 0)),
                pl.BlockSpec((n_hl, n_hidden, n_hidden), lambda i: (0, 0, 0)),
                pl.BlockSpec((n_hl, n_hidden, 1), lambda i: (0, 0, 0)),
                pl.BlockSpec((n_hidden, n_out), lambda i: (0, 0)),
                pl.BlockSpec((n_out, 1), lambda i: (0, 0)),
            ],
            out_specs=pl.BlockSpec((n_out, tile), lambda i: (0, i)),
        ),
        compiler_params=pltpu.CompilerParams(
            dimension_semantics=("parallel",),
        ),
        cost_estimate=pl.CostEstimate(
            flops=flops, transcendentals=transcendentals,
            bytes_accessed=bytes_accessed),
    )(x_t, w_in, b_in, w_h, b_h, w_out, b_out)

    # Back to the PyTorch (B, N_OUTPUT) orientation, dropping the pad rows.
    return out_t.T[:B]


def init_fcn_params(key, n_input, n_output, n_hidden, n_layers):
    """PyTorch-style uniform(-1/sqrt(fan_in), 1/sqrt(fan_in)) init.

    Weight layouts match the transposed kernel:
      w_in / w_h are the PyTorch (out_features, in_features) matrices,
      w_out is W_out^T, biases are stored as columns.
    """
    ks = jax.random.split(key, 6)

    def uni(k, shape, fan_in):
        bound = 1.0 / jnp.sqrt(jnp.float32(fan_in))
        return jax.random.uniform(k, shape, jnp.float32, -bound, bound)

    w_in = uni(ks[0], (n_hidden, n_input), n_input)
    b_in = uni(ks[1], (n_hidden, 1), n_input)
    w_h = uni(ks[2], (n_layers - 1, n_hidden, n_hidden), n_hidden)
    b_h = uni(ks[3], (n_layers - 1, n_hidden, 1), n_hidden)
    w_out = uni(ks[4], (n_hidden, n_output), n_hidden)
    b_out = uni(ks[5], (n_output, 1), n_hidden)
    return (w_in, b_in, w_h, b_h, w_out, b_out)


def fcn_reference(x, params):
    """Pure-JAX reference of the PyTorch forward pass (same param layouts)."""
    w_in, b_in, w_h, b_h, w_out, b_out = params
    h = jnp.tanh(x @ w_in.T + b_in.T)
    for l in range(w_h.shape[0]):
        h = jnp.tanh(h @ w_h[l].T + b_h[l].T)
    return h @ w_out + b_out.T


if __name__ == "__main__":
    # FCN(N_INPUT=1, N_OUTPUT=1, N_HIDDEN=32, N_LAYERS=3) on a small batch of
    # time samples t in [0, 1] (as in the pendulum script, but SMALL batch).
    N_INPUT, N_OUTPUT, N_HIDDEN, N_LAYERS = 1, 1, 32, 3
    BATCH = 16

    key = jax.random.PRNGKey(0)
    params = init_fcn_params(key, N_INPUT, N_OUTPUT, N_HIDDEN, N_LAYERS)

    t = jnp.linspace(0.0, 1.0, BATCH, dtype=jnp.float32).reshape(-1, 1)

    # dot_dtype=jnp.bfloat16 is the v6e/v7x fast path; kept at f32 here so the
    # result matches the f32 reference at 1e-5.
    out = fcn_forward(t, params, tile_b=512, dot_dtype=jnp.float32)
    out = jax.block_until_ready(out)

    ref = fcn_reference(t, params)
    assert out.shape == (BATCH, N_OUTPUT)
    assert jnp.allclose(out, ref, atol=1e-5, rtol=1e-5)

    # Also exercise a ragged batch (pads to 128-lane tiles, single grid step).
    t2 = jnp.linspace(0.0, 1.0, 50, dtype=jnp.float32).reshape(-1, 1)
    out2 = jax.block_until_ready(fcn_forward(t2, params))
    assert out2.shape == (50, N_OUTPUT)
    assert jnp.allclose(out2, fcn_reference(t2, params), atol=1e-5, rtol=1e-5)

    print("KERNEL_OK")
</pallas_src>

<mosaic_0001>
module attributes {stable_mosaic.version = 11 : i64} {
  func.func @fcn_kernel(%arg0: i32, %arg1: memref<1x128xf32, #tpu.memory_space<vmem>>, %arg2: memref<32x1xf32, #tpu.memory_space<vmem>>, %arg3: memref<32x1xf32, #tpu.memory_space<vmem>>, %arg4: memref<2x32x32xf32, #tpu.memory_space<vmem>>, %arg5: memref<2x32x1xf32, #tpu.memory_space<vmem>>, %arg6: memref<32x1xf32, #tpu.memory_space<vmem>>, %arg7: memref<1x1xf32, #tpu.memory_space<vmem>>, %arg8: memref<1x128xf32, #tpu.memory_space<vmem>>) attributes {dimension_semantics = [#tpu.dimension_semantics<parallel>], iteration_bounds = array<i64: 1>, scalar_prefetch = 0 : i64, scratch_operands = 0 : i64, tpu.core_type = #tpu.core_type<tc>, window_params = [{transform_indices = @transform_0, window_bounds = array<i64: 1, 128>}, {pipeline_mode = #tpu.pipeline_mode<synchronous>, transform_indices = @transform_1, window_bounds = array<i64: 32, 1>}, {pipeline_mode = #tpu.pipeline_mode<synchronous>, transform_indices = @transform_2, window_bounds = array<i64: 32, 1>}, {pipeline_mode = #tpu.pipeline_mode<synchronous>, transform_indices = @transform_3, window_bounds = array<i64: 2, 32, 32>}, {pipeline_mode = #tpu.pipeline_mode<synchronous>, transform_indices = @transform_4, window_bounds = array<i64: 2, 32, 1>}, {pipeline_mode = #tpu.pipeline_mode<synchronous>, transform_indices = @transform_5, window_bounds = array<i64: 32, 1>}, {pipeline_mode = #tpu.pipeline_mode<synchronous>, transform_indices = @transform_6, window_bounds = array<i64: 1, 1>}, {transform_indices = @transform_7, window_bounds = array<i64: 1, 128>}]} {
    %c0 = arith.constant 0 : index
    %c0_0 = arith.constant 0 : index
    %0 = vector.load %arg1[%c0, %c0_0] : memref<1x128xf32, #tpu.memory_space<vmem>>, vector<1x128xf32>
    %c0_1 = arith.constant 0 : index
    %c0_2 = arith.constant 0 : index
    %1 = vector.load %arg2[%c0_1, %c0_2] : memref<32x1xf32, #tpu.memory_space<vmem>>, vector<32x1xf32>
    %2 = vector.broadcast %1 : vector<32x1xf32> to vector<32x128xf32>
    %3 = vector.broadcast %0 : vector<1x128xf32> to vector<32x128xf32>
    %4 = arith.mulf %2, %3 : vector<32x128xf32>
    %c0_3 = arith.constant 0 : index
    %c0_4 = arith.constant 0 : index
    %5 = vector.load %arg3[%c0_3, %c0_4] : memref<32x1xf32, #tpu.memory_space<vmem>>, vector<32x1xf32>
    %6 = vector.broadcast %5 : vector<32x1xf32> to vector<32x128xf32>
    %7 = arith.addf %4, %6 : vector<32x128xf32>
    %8 = math.tanh %7 : vector<32x128xf32>
    %c0_5 = arith.constant 0 : index
    %c0_6 = arith.constant 0 : index
    %c0_7 = arith.constant 0 : index
    %9 = vector.load %arg4[%c0_5, %c0_6, %c0_7] : memref<2x32x32xf32, #tpu.memory_space<vmem>>, vector<1x32x32xf32>
    %10 = vector.shape_cast %9 : vector<1x32x32xf32> to vector<32x32xf32>
    %cst = arith.constant dense<0.000000e+00> : vector<32x128xf32>
    %11 = tpu.matmul %10, %8, %cst {dimension_numbers = #tpu.dot_dimension_numbers<[1], [0], [0], [1], [0, 0, 1, 1], [], []>} : vector<32x32xf32>, vector<32x128xf32>, vector<32x128xf32> -> vector<32x128xf32>
    %c0_8 = arith.constant 0 : index
    %c0_9 = arith.constant 0 : index
    %c0_10 = arith.constant 0 : index
    %12 = vector.load %arg5[%c0_8, %c0_9, %c0_10] : memref<2x32x1xf32, #tpu.memory_space<vmem>>, vector<1x32x1xf32>
    %13 = vector.shape_cast %12 : vector<1x32x1xf32> to vector<32x1xf32>
    %14 = vector.broadcast %13 : vector<32x1xf32> to vector<32x128xf32>
    %15 = arith.addf %11, %14 : vector<32x128xf32>
    %16 = math.tanh %15 : vector<32x128xf32>
    %c1 = arith.constant 1 : index
    %c0_11 = arith.constant 0 : index
    %c0_12 = arith.constant 0 : index
    %17 = vector.load %arg4[%c1, %c0_11, %c0_12] : memref<2x32x32xf32, #tpu.memory_space<vmem>>, vector<1x32x32xf32>
    %18 = vector.shape_cast %17 : vector<1x32x32xf32> to vector<32x32xf32>
    %cst_13 = arith.constant dense<0.000000e+00> : vector<32x128xf32>
    %19 = tpu.matmul %18, %16, %cst_13 {dimension_numbers = #tpu.dot_dimension_numbers<[1], [0], [0], [1], [0, 0, 1, 1], [], []>} : vector<32x32xf32>, vector<32x128xf32>, vector<32x128xf32> -> vector<32x128xf32>
    %c1_14 = arith.constant 1 : index
    %c0_15 = arith.constant 0 : index
    %c0_16 = arith.constant 0 : index
    %20 = vector.load %arg5[%c1_14, %c0_15, %c0_16] : memref<2x32x1xf32, #tpu.memory_space<vmem>>, vector<1x32x1xf32>
    %21 = vector.shape_cast %20 : vector<1x32x1xf32> to vector<32x1xf32>
    %22 = vector.broadcast %21 : vector<32x1xf32> to vector<32x128xf32>
    %23 = arith.addf %19, %22 : vector<32x128xf32>
    %24 = math.tanh %23 : vector<32x128xf32>
    %c0_17 = arith.constant 0 : index
    %c0_18 = arith.constant 0 : index
    %25 = vector.load %arg6[%c0_17, %c0_18] : memref<32x1xf32, #tpu.memory_space<vmem>>, vector<32x1xf32>
    %26 = vector.broadcast %25 : vector<32x1xf32> to vector<32x128xf32>
    %27 = arith.mulf %26, %24 : vector<32x128xf32>
    %cst_19 = arith.constant dense<0.000000e+00> : vector<128xf32>
    %28 = vector.multi_reduction <add>, %27, %cst_19 [0] : vector<32x128xf32> to vector<128xf32>
    %29 = vector.shape_cast %28 : vector<128xf32> to vector<1x128xf32>
    %c0_20 = arith.constant 0 : index
    %c0_21 = arith.constant 0 : index
    %30 = vector.load %arg7[%c0_20, %c0_21] : memref<1x1xf32, #tpu.memory_space<vmem>>, vector<1x1xf32>
    %31 = vector.broadcast %30 : vector<1x1xf32> to vector<1x128xf32>
    %32 = arith.addf %29, %31 : vector<1x128xf32>
    %c0_22 = arith.constant 0 : index
    %c0_23 = arith.constant 0 : index
    %33 = vector.load %arg8[%c0_22, %c0_23] : memref<1x128xf32, #tpu.memory_space<vmem>>, vector<1x128xf32>
    tpu.vector_store %arg8[%c0_22, %c0_23], %32 {strides = array<i32>} : memref<1x128xf32, #tpu.memory_space<vmem>>, vector<1x128xf32>,
    return
  }
  func.func @transform_0(%arg0: i32) -> (i32, i32) {
    %c0_i32 = arith.constant 0 : i32
    %c0_i32_0 = arith.constant 0 : i32
    return %c0_i32, %arg0 : i32, i32
  }
  func.func @transform_1(%arg0: i32) -> (i32, i32) {
    %c0_i32 = arith.constant 0 : i32
    %c0_i32_0 = arith.constant 0 : i32
    %c0_i32_1 = arith.constant 0 : i32
    return %c0_i32, %c0_i32_0 : i32, i32
  }
  func.func @transform_2(%arg0: i32) -> (i32, i32) {
    %c0_i32 = arith.constant 0 : i32
    %c0_i32_0 = arith.constant 0 : i32
    %c0_i32_1 = arith.constant 0 : i32
    return %c0_i32, %c0_i32_0 : i32, i32
  }
  func.func @transform_3(%arg0: i32) -> (i32, i32, i32) {
    %c0_i32 = arith.constant 0 : i32
    %c0_i32_0 = arith.constant 0 : i32
    %c0_i32_1 = arith.constant 0 : i32
    %c0_i32_2 = arith.constant 0 : i32
    return %c0_i32, %c0_i32_0, %c0_i32_1 : i32, i32, i32
  }
  func.func @transform_4(%arg0: i32) -> (i32, i32, i32) {
    %c0_i32 = arith.constant 0 : i32
    %c0_i32_0 = arith.constant 0 : i32
    %c0_i32_1 = arith.constant 0 : i32
    %c0_i32_2 = arith.constant 0 : i32
    return %c0_i32, %c0_i32_0, %c0_i32_1 : i32, i32, i32
  }
  func.func @transform_5(%arg0: i32) -> (i32, i32) {
    %c0_i32 = arith.constant 0 : i32
    %c0_i32_0 = arith.constant 0 : i32
    %c0_i32_1 = arith.constant 0 : i32
    return %c0_i32, %c0_i32_0 : i32, i32
  }
  func.func @transform_6(%arg0: i32) -> (i32, i32) {
    %c0_i32 = arith.constant 0 : i32
    %c0_i32_0 = arith.constant 0 : i32
    %c0_i32_1 = arith.constant 0 : i32
    return %c0_i32, %c0_i32_0 : i32, i32
  }
  func.func @transform_7(%arg0: i32) -> (i32, i32) {
    %c0_i32 = arith.constant 0 : i32
    %c0_i32_0 = arith.constant 0 : i32
    return %c0_i32, %arg0 : i32, i32
  }
}

</mosaic_0001>

<bundles_post_ra>
// kernel: tpu_custom_call.1
= control target key start
LH: loop header
LB: loop body
LE: loop exit
PB: predicated region body
PF: predicated region fallthrough
CT: control target
= control target key end

     0   :  { %s527_s0 = inlined_call_operand.vmem [shape: f32[1,128], index: 0, kind: input, shape index: {}]   ;;  %s528_s1 = inlined_call_operand.vmem [shape: f32[32,1], index: 1, kind: input, shape index: {}]   ;;  %s529_s2 = inlined_call_operand.vmem [shape: f32[32,1], index: 2, kind: input, shape index: {}]   ;;  %s530_s3 = inlined_call_operand.vmem [shape: f32[2,32,32], index: 3, kind: input, shape index: {}]   ;;  %s531_s4 = inlined_call_operand.vmem [shape: f32[2,32,1], index: 4, kind: input, shape index: {}]   ;;  %s532_s5 = inlined_call_operand.vmem [shape: f32[32,1], index: 5, kind: input, shape index: {}]   ;;  %s533_s6 = inlined_call_operand.<no memory space> [shape: f32[1,1], index: 6, kind: input, shape index: {}]   ;;  %s534_s7 = inlined_call_operand.hbm [shape: f32[1,128], index: 7, kind: output, shape index: {}]  }
   0x1   :  { %v12_v0 = vstv %s533_s6 }
   0x2   :  { %13 = vst [vmem:[#allocation2] sm:$0x1] %v12_v0 }
   0x3   :  { %v63_v1 = vld [vmem:[%s529_s2 + $0x10] sm:$0xff]  ;;  %v64_v2 = vld [vmem:[%s529_s2 + $0x18] sm:$0xff]  ;;  %v384_v4 = vmov 0  }
   0x4   :  { %v33_v3 = vld [vmem:[%s528_s1 + $0x18] sm:$0xff]  ;;  %332 = vset.pattern.permute.xlu2 %v384_v4  ;;  %331 = vset.pattern.permute.xlu1 %v384_v4 }
   0x5   :  { %330 = vset.pattern.permute.xlu0 %v384_v4  ;;  %77 = vperm.xlu2 %332, %v63_v1  }
   0x6   :  { %82 = vperm.xlu1 %331, %v64_v2   ;;  %51 = vperm.xlu0 %330, %v33_v3  }
   0x7   :  { %14 = vsyncpa [#allocation4], 0  ;;  %v30_v5 = vld [vmem:[%s528_s1] sm:$0xff]  ;;  %v32_v6 = vld [vmem:[%s528_s1 + $0x10] sm:$0xff]  ;;  %vm121_vm0 = vcmask 261120   ;;  %s295_s6 = sshll.u32 %s534_s7, 4  ;;  %s296_s6 = int_to_ptr.hbm [resolvable:$true] %s295_s6 }
   0x8   :  { %v31_v7 = vld [vmem:[%s528_s1 + $0x8] sm:$0xff]  ;;  %v100_v8 = vld [vmem:[%s531_s4 + $0x18] sm:$0xff]  ;;  %v61_v10 = vld [vmem:[%s529_s2] sm:$0xff] }
   0x9   :  { %v62_v9 = vld [vmem:[%s529_s2 + $0x8] sm:$0xff]  ;;  %v97_v11 = vld [vmem:[%s531_s4] sm:$0xff]  ;;  %v99_v12 = vld [vmem:[%s531_s4 + $0x10] sm:$0xff] }
   0xa   :  { %v98_v13 = vld [vmem:[%s531_s4 + $0x8] sm:$0xff]  ;;  %v314_v14 = vld [vmem:[%s531_s4 + $0x30] sm:$0xff]  ;;  %v312_v15 = vld [vmem:[%s531_s4 + $0x20] sm:$0xff] }
   0xb   :  { %v313_v16 = vld [vmem:[%s531_s4 + $0x28] sm:$0xff]  ;;  %v315_v18 = vld [vmem:[%s531_s4 + $0x38] sm:$0xff]  ;;  %v242_v19 = vld [vmem:[%s532_s5] sm:$0xff] }
   0xc   :  { %v243_v17 = vld [vmem:[%s532_s5 + $0x8] sm:$0xff]  ;;  %v279_v20 = vld [vmem:[#allocation2] sm:$0x1]  ;;  %v244_v21 = vld [vmem:[%s532_s5 + $0x10] sm:$0xff] }
   0xd   :  { %36 = vperm.xlu2 %332, %v30_v5   ;;  %v245_v22 = vld [vmem:[%s532_s5 + $0x18] sm:$0xff]  ;;  %v333_v23 = vld [vmem:[%s527_s0] ss:$0 sm:$0xff]  ;;  %v95_v44 = vld [vmem:[%s530_s3 + $0x10] sm:$0xff] }
   0xe   :  { %46 = vperm.xlu0 %330, %v32_v6   ;;  %41 = vperm.xlu1 %331, %v31_v7   ;;  %v93_v43 = vld [vmem:[%s530_s3] sm:$0xff]  ;;  %v94_v46 = vld [vmem:[%s530_s3 + $0x8] sm:$0xff]  ;;  %v96_v47 = vld [vmem:[%s530_s3 + $0x18] sm:$0xff] }
   0xf   :  { %v308_v63 = vld [vmem:[%s530_s3 + $0x20] sm:$0xff]  ;;  %v310_v0 = vld [vmem:[%s530_s3 + $0x30] sm:$0xff]  ;;  %v309_v2 = vld [vmem:[%s530_s3 + $0x28] sm:$0xff] }
  0x10   :  { %v311_v3 = vld [vmem:[%s530_s3 + $0x38] sm:$0xff]  ;;  %s385_s3 = smov [#allocation3]  }
  0x11   :  { %s293_s29 = sshll.u32 %s385_s3, 4  ;;  %s294_s29 = int_to_ptr.vmem [resolvable:$true] %s293_s29 }
  0x15   :  { %118 = vperm.xlu2 %332, %v100_v8  }
  0x16   :  { %72 = vperm.xlu0 %330, %v62_v9   ;;  %67 = vperm.xlu1 %331, %v61_v10  }
  0x1d   :  { %103 = vperm.xlu2 %332, %v97_v11  }
  0x1e   :  { %113 = vperm.xlu0 %330, %v99_v12   ;;  %108 = vperm.xlu1 %331, %v98_v13  }
  0x25   :  { %189 = vperm.xlu2 %332, %v314_v14  }
  0x26   :  { %179 = vperm.xlu0 %330, %v312_v15   ;;  %184 = vperm.xlu1 %331, %v313_v16  }
  0x2d   :  { %253 = vperm.xlu2 %332, %v243_v17  }
  0x2e   :  { %194 = vperm.xlu0 %330, %v315_v18   ;;  %248 = vperm.xlu1 %331, %v242_v19  }
  0x35   :  { %282 = vperm.xlu2 %332, %v279_v20  }
  0x36   :  { %258 = vperm.xlu0 %330, %v244_v21   ;;  %263 = vperm.xlu1 %331, %v245_v22  }
  0x5f   :  { %v78_v28 = vpop.permute.xlu2 %77 }
  0x67   :  { %v37_v34 = vpop.permute.xlu2 %36 }
  0x68   :  { %v57_v35 = vmul.f32 %v333_v23, %v37_v34 }
  0x6f   :  { %v119_v50 = vpop.permute.xlu2 %118 }
  0x77   :  { %v104_v58 = vpop.permute.xlu2 %103 }
  0x78   :  { %v83_v24 = vpop.permute.xlu1 %82  ;;  %v52_v25 = vpop.permute.xlu0 %51 }
  0x79   :  { %v60_v26 = vmul.f32 %v333_v23, %v52_v25 }
  0x7b   :  { %v88_v27 = vadd.f32 %v83_v24, %v60_v26 }
  0x7d   :  { %334 = vtanh.f32 %v88_v27 }
  0x7f   :  { %v190_v9 = vpop.permute.xlu2 %189 }
  0x80   :  { %v47_v29 = vpop.permute.xlu0 %46  ;;  %v42_v30 = vpop.permute.xlu1 %41 }
  0x81   :  { %v59_v31 = vmul.f32 %v333_v23, %v47_v29  ;;  %v58_v36 = vmul.f32 %v333_v23, %v42_v30 }
  0x83   :  { %v335_v32 = vpop.eup %334  ;;  %v87_v33 = vadd.f32 %v78_v28, %v59_v31 }
  0x84   :  { %146 = vmatpush.msra.mxu0 %v335_v32  ;;  %320 = vmatpush.msra.mxu2 %v335_v32 }
  0x85   :  { %336 = vtanh.f32 %v87_v33 }
  0x87   :  { %v254_v19 = vpop.permute.xlu2 %253 }
  0x88   :  { %v73_v37 = vpop.permute.xlu0 %72  ;;  %v68_v38 = vpop.permute.xlu1 %67 }
  0x89   :  { %v86_v39 = vadd.f32 %v73_v37, %v58_v36  ;;  %v85_v40 = vadd.f32 %v68_v38, %v57_v35 }
  0x8b   :  { %v337_v41 = vpop.eup %336  ;;  %338 = vtanh.f32 %v86_v39 }
  0x8c   :  { %147 = vmatpush.msra.mxu0 %v337_v41  ;;  %321 = vmatpush.msra.mxu2 %v337_v41  ;;  %340 = vtanh.f32 %v85_v40 }
  0x8f   :  { %v283_v35 = vpop.permute.xlu2 %282 }
  0x90   :  { %v114_v51 = vpop.permute.xlu0 %113  ;;  %v109_v56 = vpop.permute.xlu1 %108  ;;  %v285_v37 = vperm.slane %v283_v35, 0 }
  0x91   :  { %v339_v42 = vpop.eup %338 }
  0x92   :  { %148 = vmatpush.msra.mxu0 %v339_v42  ;;  %322 = vmatpush.msra.mxu2 %v339_v42  ;;  %v341_v45 = vpop.eup %340 }
  0x94   :  { %149 = vmatpush.msra.mxu0 %v341_v45  ;;  %323 = vmatpush.msra.mxu2 %v341_v45 }
  0x95   :  { %304 = vmatmul.msk.f32.vlgmr.msra.gmra.mxu0 %vm121_vm0, %v93_v43  ;;  %306 = vmatmul.msk.f32.vlgmr.msra.gmra.mxu2 %vm121_vm0, %v95_v44 }
  0x98   :  { %v180_v5 = vpop.permute.xlu0 %179  ;;  %v185_v6 = vpop.permute.xlu1 %184 }
  0x9d   :  { %305 = vmatmul.msk.f32.gmra.mxu0 %vm121_vm0, %v94_v46  ;;  %307 = vmatmul.msk.f32.gmra.mxu2 %vm121_vm0, %v96_v47 }
  0xa0   :  { %v195_v13 = vpop.permute.xlu0 %194  ;;  %v249_v14 = vpop.permute.xlu1 %248 }
  0xa8   :  { %v259_v24 = vpop.permute.xlu0 %258  ;;  %v264_v27 = vpop.permute.xlu1 %263 }
 0x112   :  { %v151_v48 = vpop.f32.mrf.mxu0 }
 0x113   :  { %v152_v59 = vadd.f32 %v151_v48, %v104_v58 }
 0x118   :  { %v157_v49 = vpop.f32.mrf.mxu2 }
 0x119   :  { %v158_v54 = vadd.f32 %v157_v49, %v114_v51 }
 0x11a   :  { %v154_v52 = vpop.f32.mrf.mxu0 }
 0x11b   :  { %v155_v57 = vadd.f32 %v154_v52, %v109_v56 }
 0x120   :  { %v160_v53 = vpop.f32.mrf.mxu2 }
 0x121   :  { %v161_v55 = vadd.f32 %v160_v53, %v119_v50 }
 0x123   :  { %342 = vtanh.f32 %v161_v55 }
 0x124   :  { %344 = vtanh.f32 %v158_v54 }
 0x125   :  { %346 = vtanh.f32 %v155_v57 }
 0x126   :  { %348 = vtanh.f32 %v152_v59 }
 0x129   :  { %v343_v60 = vpop.eup %342 }
 0x12a   :  { %221 = vmatpush.msra.mxu1 %v343_v60  ;;  %324 = vmatpush.msra.mxu3 %v343_v60  ;;  %v345_v61 = vpop.eup %344 }
 0x12b   :  { %v347_v62 = vpop.eup %346 }
 0x12c   :  { %222 = vmatpush.msra.mxu1 %v345_v61  ;;  %325 = vmatpush.msra.mxu3 %v345_v61  ;;  %v349_v1 = vpop.eup %348 }
 0x12e   :  { %223 = vmatpush.msra.mxu1 %v347_v62  ;;  %326 = vmatpush.msra.mxu3 %v347_v62 }
 0x130   :  { %224 = vmatpush.msra.mxu1 %v349_v1  ;;  %327 = vmatpush.msra.mxu3 %v349_v1 }
 0x131   :  { %316 = vmatmul.msk.f32.vlgmr.msra.gmra.mxu1 %vm121_vm0, %v308_v63  ;;  %318 = vmatmul.msk.f32.vlgmr.msra.gmra.mxu3 %vm121_vm0, %v310_v0 }
 0x139   :  { %317 = vmatmul.msk.f32.gmra.mxu1 %vm121_vm0, %v309_v2  ;;  %319 = vmatmul.msk.f32.gmra.mxu3 %vm121_vm0, %v311_v3 }
 0x1ae   :  { %v226_v4 = vpop.f32.mrf.mxu1 }
 0x1af   :  { %v227_v7 = vadd.f32 %v226_v4, %v180_v5 }
 0x1b1   :  { %350 = vtanh.f32 %v227_v7 }
 0x1b4   :  { %v232_v8 = vpop.f32.mrf.mxu3 }
 0x1b5   :  { %v233_v11 = vadd.f32 %v232_v8, %v190_v9 }
 0x1b6   :  { %v229_v10 = vpop.f32.mrf.mxu1 }
 0x1b7   :  { %v230_v12 = vadd.f32 %v229_v10, %v185_v6  ;;  %v351_v16 = vpop.eup %350 }
 0x1b8   :  { %v266_v20 = vmul.f32 %v351_v16, %v249_v14 }
 0x1b9   :  { %352 = vtanh.f32 %v230_v12 }
 0x1ba   :  { %354 = vtanh.f32 %v233_v11 }
 0x1bc   :  { %v235_v15 = vpop.f32.mrf.mxu3 }
 0x1bd   :  { %v236_v17 = vadd.f32 %v235_v15, %v195_v13 }
 0x1bf   :  { %v353_v18 = vpop.eup %352  ;;  %356 = vtanh.f32 %v236_v17 }
 0x1c0   :  { %v267_v21 = vmul.f32 %v353_v18, %v254_v19  ;;  %v355_v22 = vpop.eup %354 }
 0x1c1   :  { %v268_v25 = vmul.f32 %v355_v22, %v259_v24 }
 0x1c2   :  { %v270_v23 = vadd.f32 %v267_v21, %v266_v20 }
 0x1c4   :  { %v271_v29 = vadd.f32 %v270_v23, %v268_v25 }
 0x1c5   :  { %v357_v26 = vpop.eup %356 }
 0x1c6   :  { %v269_v28 = vmul.f32 %v357_v26, %v264_v27 }
 0x1c8   :  { %v272_v30 = vadd.f32 %v271_v29, %v269_v28 }
 0x1ca   :  { %v273_v31 = vrot.slane %v272_v30, 4 }
 0x1cc   :  { %v274_v32 = vadd.f32 %v273_v31, %v272_v30 }
 0x1ce   :  { %v275_v33 = vrot.slane %v274_v32, 2 }
 0x1d0   :  { %v276_v34 = vadd.f32 %v275_v33, %v274_v32 }
 0x1d2   :  { %v277_v36 = vrot.slane %v276_v34, 1 }
 0x1d4   :  { %v278_v38 = vadd.f32 %v277_v36, %v276_v34 }
 0x1d6   :  { %v286_v39 = vadd.f32 %v285_v37, %v278_v38 }
 0x1d8   :  { %287 = vst [vmem:[#allocation3] sm:$0x1] %v286_v39 }
 0x1d9   :  { %298 = dma.vmem_to_hbm [thread:$0]  %s294_s29, 16, %s296_s6, [#allocation4]  }
 0x1da   :  { %382 = dma.done.wait [#allocation4], 16  }
 0x1db   :  { %383 = vsyncadd [#allocation4], 4294967280 }
 0x1dc   :  { %303 = vsyncpa [#allocation4], 1 }

</bundles_post_ra>
